<compile_context>
chip_gen: v7x
topology: tpu7x:2x2x1
jax: 0.10.0
libtpu: 0.0.40
codegen_flags: <defaults>
</compile_context>

<pallas_src>
import jax
import jax.numpy as jnp
from jax.experimental import pallas as pl
from jax.experimental.pallas import tpu as pltpu


def _round_up(x, m):
    return ((x + m - 1) // m) * m


def _vmem_budget_bytes(tm, tn, tk):
    # double-buffered f32 input/output blocks + f32 accumulator, then headroom.
    one_buf = 4 * (tm * tk + tk * tn + tn + tm * tn)
    need = 2 * one_buf + 4 * tm * tn
    return int(min(48 * 1024 * 1024, max(16 * 1024 * 1024, 2 * need)))


# --------------------------- kernel bodies ---------------------------------

def _linear_relu_single_kernel(x_ref, w_ref, b_ref, o_ref):
    # Full K extent in one tile: pure MXU matmul + fused bias/ReLU epilogue.
    y = jnp.dot(x_ref[...], w_ref[...], preferred_element_type=jnp.float32)
    o_ref[...] = jnp.maximum(y + b_ref[...], 0.0).astype(o_ref.dtype)


def _linear_relu_ktiled_kernel(x_ref, w_ref, b_ref, o_ref, acc_ref):
    # K split over grid axis 2.  First k-step WRITES the accumulator
    # (no zero-fill + read-back), later steps accumulate; epilogue on last.
    k = pl.program_id(2)
    partial = jnp.dot(x_ref[...], w_ref[...], preferred_element_type=jnp.float32)

    @pl.when(k == 0)
    def _():
        acc_ref[...] = partial

    @pl.when(k > 0)
    def _():
        acc_ref[...] += partial

    @pl.when(k == pl.num_programs(2) - 1)
    def _():
        o_ref[...] = jnp.maximum(acc_ref[...] + b_ref[...], 0.0).astype(o_ref.dtype)


# --------------------------- wrapper ----------------------------------------

def prepare_params(weight, bias, *, tn_cap=256, tk_cap=512):
    """One-time (init-time) parameter prep: transpose + any lane padding.

    weight: (N, K) as stored by nn.Linear; bias: (N,).
    Returns (weight_t, bias2d, N) to pass to sample_to_matrix.  Doing the
    padding here keeps jnp.pad of the (large) weight off the per-call path.
    Caps must match the ones passed to sample_to_matrix.
    """
    N, K = weight.shape
    w_t = weight.T  # (K, N)

    # Small dims stay full-extent (exempt from the (8,128) rule -> no pad).
    Kp = K if K <= tk_cap else _round_up(K, tk_cap)
    Np = N if N <= tn_cap else _round_up(N, tn_cap)
    if (Kp, Np) != (K, N):
        w_t = jnp.pad(w_t, ((0, Kp - K), (0, Np - N)))
    b = bias if Np == N else jnp.pad(bias, ((0, Np - N),))
    return w_t, b.reshape(1, Np), N


def sample_to_matrix(sample, weight_t, bias2d, out_feature, *,
                     tm_cap=256, tn_cap=256, tk_cap=512):
    """sample: (B, K) f32; weight_t: (Kp, Np) pre-padded; bias2d: (1, Np)."""
    B, K = sample.shape
    Kp, Np = weight_t.shape
    N = out_feature * out_feature
    assert Kp >= K and Np >= N

    # ---- tile selection -----------------------------------------------------
    # M: full-extent block when the batch is small (no x padding needed).
    if B <= tm_cap:
        tm, Mp = B, B
    else:
        tm = tm_cap
        Mp = _round_up(B, tm)

    # K: single full-extent tile when it fits -> no reduction axis at all.
    tk = Kp if Kp <= tk_cap else tk_cap
    # N: single full-extent tile when small; otherwise <=256-wide lane-dense
    # tiles so v7x's two TensorCores both get >=1 "parallel" tile at real N.
    tn = Np if Np <= tn_cap else tn_cap
    assert Kp % tk == 0 and Np % tn == 0, "prepare_params caps must match"

    # Only pad x when the tiled path actually needs it (never at demo shapes).
    x = sample
    if (Mp, Kp) != (B, K):
        x = jnp.pad(x, ((0, Mp - B), (0, Kp - K)))

    n_m, n_n, n_k = Mp // tm, Np // tn, Kp // tk

    cost = pl.CostEstimate(
        flops=2 * Mp * Np * Kp,
        transcendentals=0,
        bytes_accessed=4 * (Mp * Kp + Kp * Np + Mp * Np + Np),
    )
    vmem_bytes = _vmem_budget_bytes(tm, tn, tk)

    if n_k == 1:
        # Fast path: no accumulator scratch, no K grid axis, no branches.
        y = pl.pallas_call(
            _linear_relu_single_kernel,
            out_shape=jax.ShapeDtypeStruct((Mp, Np), jnp.float32),
            grid_spec=pltpu.PrefetchScalarGridSpec(
                num_scalar_prefetch=0,
                grid=(n_m, n_n),
                in_specs=[
                    pl.BlockSpec((tm, tk), lambda i, j: (i, 0)),
                    pl.BlockSpec((tk, tn), lambda i, j: (0, j)),
                    pl.BlockSpec((1, tn), lambda i, j: (0, j)),
                ],
                out_specs=pl.BlockSpec((tm, tn), lambda i, j: (i, j)),
            ),
            compiler_params=pltpu.CompilerParams(
                dimension_semantics=("parallel", "parallel"),
                vmem_limit_bytes=vmem_bytes,
            ),
            cost_estimate=cost,
        )(x, weight_t, bias2d)
    else:
        # General path: K reduction on grid axis 2 with f32 VMEM accumulator.
        y = pl.pallas_call(
            _linear_relu_ktiled_kernel,
            out_shape=jax.ShapeDtypeStruct((Mp, Np), jnp.float32),
            grid_spec=pltpu.PrefetchScalarGridSpec(
                num_scalar_prefetch=0,
                grid=(n_m, n_n, n_k),
                in_specs=[
                    pl.BlockSpec((tm, tk), lambda i, j, k: (i, k)),
                    # deeper buffering on the streamed weight operand
                    pl.BlockSpec((tk, tn), lambda i, j, k: (k, j),
                                 pipeline_mode=pl.Buffered(3)),
                    pl.BlockSpec((1, tn), lambda i, j, k: (0, j)),
                ],
                out_specs=pl.BlockSpec((tm, tn), lambda i, j, k: (i, j)),
                scratch_shapes=[pltpu.VMEM((tm, tn), jnp.float32)],
            ),
            compiler_params=pltpu.CompilerParams(
                dimension_semantics=("parallel", "parallel", "arbitrary"),
                vmem_limit_bytes=vmem_bytes,
            ),
            cost_estimate=cost,
        )(x, weight_t, bias2d)

    if (Mp, Np) != (B, N):
        y = y[:B, :N]
    # x.view(-1, 1, F, F) -- plain-JAX glue
    return y.reshape(-1, 1, out_feature, out_feature)


if __name__ == "__main__":
    # Small shapes consistent with the module: batch=2, n_genes=32, out_feature=8
    B = 2
    n_genes = 32
    out_feature = 8
    out_dim = out_feature * out_feature

    key = jax.random.PRNGKey(0)
    k_x, k_w, k_b = jax.random.split(key, 3)

    # Deterministic init (mimics nn.Linear's uniform(-1/sqrt(in), 1/sqrt(in)))
    bound = 1.0 / (n_genes ** 0.5)
    weight = jax.random.uniform(k_w, (out_dim, n_genes), jnp.float32, -bound, bound)
    bias = jax.random.uniform(k_b, (out_dim,), jnp.float32, -bound, bound)
    sample = jax.random.normal(k_x, (B, n_genes), jnp.float32)

    # One-time parameter prep (transpose + any padding happens here, not per call).
    weight_t, bias2d, _ = prepare_params(weight, bias)

    out = sample_to_matrix(sample, weight_t, bias2d, out_feature)
    out = jax.block_until_ready(out)

    # Sanity check against pure-JAX reference
    ref = jnp.maximum(sample @ weight.T + bias, 0.0).reshape(
        -1, 1, out_feature, out_feature
    )
    assert out.shape == (B, 1, out_feature, out_feature)
    assert jnp.allclose(out, ref, atol=1e-5, rtol=1e-5)

    print("KERNEL_OK")
</pallas_src>

<mosaic_0001>
module attributes {stable_mosaic.version = 11 : i64} {
  func.func @_linear_relu_single_kernel(%arg0: i32, %arg1: i32, %arg2: memref<2x32xf32, #tpu.memory_space<vmem>>, %arg3: memref<32x64xf32, #tpu.memory_space<vmem>>, %arg4: memref<1x64xf32, #tpu.memory_space<vmem>>, %arg5: memref<2x64xf32, #tpu.memory_space<vmem>>) attributes {dimension_semantics = [#tpu.dimension_semantics<parallel>, #tpu.dimension_semantics<parallel>], iteration_bounds = array<i64: 1, 1>, scalar_prefetch = 0 : i64, scratch_operands = 0 : i64, tpu.core_type = #tpu.core_type<tc>, window_params = [{transform_indices = @transform_0, window_bounds = array<i64: 2, 32>}, {transform_indices = @transform_1, window_bounds = array<i64: 32, 64>}, {transform_indices = @transform_2, window_bounds = array<i64: 1, 64>}, {transform_indices = @transform_3, window_bounds = array<i64: 2, 64>}]} {
    %c0 = arith.constant 0 : index
    %c0_0 = arith.constant 0 : index
    %0 = vector.load %arg2[%c0, %c0_0] : memref<2x32xf32, #tpu.memory_space<vmem>>, vector<2x32xf32>
    %c0_1 = arith.constant 0 : index
    %c0_2 = arith.constant 0 : index
    %1 = vector.load %arg3[%c0_1, %c0_2] : memref<32x64xf32, #tpu.memory_space<vmem>>, vector<32x64xf32>
    %cst = arith.constant dense<0.000000e+00> : vector<2x64xf32>
    %2 = tpu.matmul %0, %1, %cst {dimension_numbers = #tpu.dot_dimension_numbers<[1], [0], [0], [1], [0, 0, 1, 1], [], []>} : vector<2x32xf32>, vector<32x64xf32>, vector<2x64xf32> -> vector<2x64xf32>
    %c0_3 = arith.constant 0 : index
    %c0_4 = arith.constant 0 : index
    %3 = vector.load %arg4[%c0_3, %c0_4] : memref<1x64xf32, #tpu.memory_space<vmem>>, vector<1x64xf32>
    %4 = vector.broadcast %3 : vector<1x64xf32> to vector<2x64xf32>
    %5 = arith.addf %2, %4 : vector<2x64xf32>
    %cst_5 = arith.constant 0.000000e+00 : f32
    %6 = vector.broadcast %cst_5 : f32 to vector<2x64xf32>
    %7 = arith.maximumf %5, %6 : vector<2x64xf32>
    %c0_6 = arith.constant 0 : index
    %c0_7 = arith.constant 0 : index
    %8 = vector.load %arg5[%c0_6, %c0_7] : memref<2x64xf32, #tpu.memory_space<vmem>>, vector<2x64xf32>
    tpu.vector_store %arg5[%c0_6, %c0_7], %7 {strides = array<i32>} : memref<2x64xf32, #tpu.memory_space<vmem>>, vector<2x64xf32>,
    return
  }
  func.func @transform_0(%arg0: i32, %arg1: i32) -> (i32, i32) {
    %c0_i32 = arith.constant 0 : i32
    %c0_i32_0 = arith.constant 0 : i32
    return %arg0, %c0_i32 : i32, i32
  }
  func.func @transform_1(%arg0: i32, %arg1: i32) -> (i32, i32) {
    %c0_i32 = arith.constant 0 : i32
    %c0_i32_0 = arith.constant 0 : i32
    return %c0_i32, %arg1 : i32, i32
  }
  func.func @transform_2(%arg0: i32, %arg1: i32) -> (i32, i32) {
    %c0_i32 = arith.constant 0 : i32
    %c0_i32_0 = arith.constant 0 : i32
    return %c0_i32, %arg1 : i32, i32
  }
  func.func @transform_3(%arg0: i32, %arg1: i32) -> (i32, i32) {
    %c0_i32 = arith.constant 0 : i32
    return %arg0, %arg1 : i32, i32
  }
}

</mosaic_0001>

<bundles_post_ra>
// kernel: tpu_custom_call.1
= control target key start
LH: loop header
LB: loop body
LE: loop exit
PB: predicated region body
PF: predicated region fallthrough
CT: control target
= control target key end

     0   :  { %8 = vsyncpa [#allocation3], 0  ;;  %s324_s0 = inlined_call_operand.hbm [shape: f32[2,32], index: 0, kind: input, shape index: {}]   ;;  %s325_s1 = inlined_call_operand.hbm [shape: f32[32,64], index: 1, kind: input, shape index: {}]   ;;  %s326_s2 = inlined_call_operand.vmem [shape: f32[1,64], index: 2, kind: input, shape index: {}]   ;;  %s327_s3 = inlined_call_operand.hbm [shape: f32[2,64], index: 3, kind: output, shape index: {}]  }
   0x1   :  { %9 = vsyncpa [#allocation6], 0 }
   0x2   :  { %10 = vsyncpa [#allocation4], 0  ;;  %s250_s12 = smov [#allocation2]   ;;  %s251_s14 = smov [#allocation5]  }
   0x3   :  { %s17_s13 = sshll.u32 %s250_s12, 4  ;;  %s26_s15 = sshll.u32 %s251_s14, 4  ;;  %s18_s13 = int_to_ptr.vmem [resolvable:$true] %s17_s13  ;;  %s278_s15 = int_to_ptr.vmem [resolvable:$true] %s26_s15 }
   0x4   :  { %s178_s18 = scalar_lea.hbm %s324_s0, 32 }
   0x5   :  { %p179_p0 = scmp.ne.s32.totalorder %s324_s0, %s178_s18  ;;  %p182_p1 = scmp.lt.u32.totalorder %s178_s18, %s324_s0 }
   0x7   :  { %p184_p2 = pnand %p182_p1, %p179_p0 }
   0x9   :  { %187 = shalt.err (!%p184_p2)
}
   0xa   :  { %s188_s23 = scalar_lea.vmem %s18_s13, 32  ;;  %p193_p4 = scmp.lt.s32.totalorder %s18_s13, %s18_s13 }
   0xb   :  { %p189_p3 = scmp.ne.s32.totalorder %s18_s13, %s188_s23  ;;  %p194_p5 = scmp.lt.s32.totalorder %s188_s23, %s188_s23 }
   0xd   :  { %p195_p6 = por %p194_p5, %p193_p4 }
   0xf   :  { %p196_p7 = pnand %p195_p6, %p189_p3 }
  0x11   :  { %199 = shalt.err (!%p196_p7)
}
  0x12   :  { %20 = dma.hbm_to_vmem [thread:$0]  %s324_s0, 32, %s18_s13, [#allocation3]  }
  0x13   :  { %s200_s28 = scalar_lea.hbm %s325_s1, 512 }
  0x14   :  { %p201_p8 = scmp.ne.s32.totalorder %s325_s1, %s200_s28  ;;  %p204_p9 = scmp.lt.u32.totalorder %s200_s28, %s325_s1 }
  0x16   :  { %p206_p10 = pnand %p204_p9, %p201_p8 }
  0x18   :  { %209 = shalt.err (!%p206_p10)
}
  0x19   :  { %s210_s6 = scalar_lea.vmem %s278_s15, 512  ;;  %p215_p12 = scmp.lt.s32.totalorder %s278_s15, %s278_s15 }
  0x1a   :  { %p211_p11 = scmp.ne.s32.totalorder %s278_s15, %s210_s6  ;;  %p216_p13 = scmp.lt.s32.totalorder %s210_s6, %s210_s6 }
  0x1c   :  { %p217_p0 = por %p216_p13, %p215_p12 }
  0x1e   :  { %p218_p1 = pnand %p217_p0, %p211_p11 }
  0x20   :  { %221 = shalt.err (!%p218_p1)
}
  0x21   :  { %s252_s0 = smov 128   ;;  %s253_s7 = smov 8  }
  0x22   :  { %32 = dma.hbm_to_vmem [thread:$0]  %s325_s1, 512, %s278_s15, [#allocation6], %s252_s0, %s252_s0, %s253_s7  }
  0x23   :  { %244 = dma.done.wait [#allocation3], 32  }
  0x24   :  { %245 = vsyncadd [#allocation3], 4294967264 }
  0x25   :  { %246 = dma.done.wait [#allocation6], 512  }
  0x26   :  { %247 = vsyncadd [#allocation6], 4294966784  ;;  %v254_v0 = vmov 0.0|0.0   ;;  %vm255_vm0 = vmmov 0   ;;  %v256_v1 = vmov 0.0   ;;  %v42_v2 = vld [vmem:[#allocation5] sm:$0xff] }
  0x27   :  { %164 = vmatprep.subr.bf16.mxu0 %v254_v0  ;;  %161 = vmatprep.mubr.msk.f32.mxu0 %vm255_vm0, %v256_v1  ;;  %v43_v3 = vld [vmem:[#allocation5 + $0x8] sm:$0xff]  ;;  %v44_v4 = vld [vmem:[#allocation5 + $0x10] sm:$0xff]  ;;  %v45_v6 = vld [vmem:[#allocation5 + $0x18] sm:$0xff]  ;;  %vm53_vm1 = vcmask 261120   ;;  %s257_s11 = smov [#allocation7]   ;;  %vm128_vm2 = vcmask 517120  }
  0x28   :  { %v165_v5 = vpack.c.bf16 %v43_v3, %v42_v2  ;;  %v168_v7 = vpack.c.bf16 %v45_v6, %v44_v4  ;;  %v41_v8 = vld [vmem:[#allocation2] sm:$0x3]  ;;  %s136_s12 = sshll.u32 %s257_s11, 4  ;;  %s137_s12 = int_to_ptr.vmem [resolvable:$true] %s136_s12 }
  0x29   :  { %v146_v9 = vld [vmem:[%s326_s2] ss:$0 sm:$0xff]  ;;  %s222_s13 = scalar_lea.vmem %s137_s12, 32  ;;  %p227_p3 = scmp.lt.s32.totalorder %s137_s12, %s137_s12 }
  0x2a   :  { %166 = vmatpush3.bf16.msra.mxu0 %v165_v5  ;;  %p223_p2 = scmp.ne.s32.totalorder %s137_s12, %s222_s13  ;;  %p228_p4 = scmp.lt.s32.totalorder %s222_s13, %s222_s13 }
  0x2b   :  { %167 = vmatprep.subr.bf16.mxu0 %v254_v0 }
  0x2c   :  { %p229_p5 = por %p228_p4, %p227_p3 }
  0x2e   :  { %169 = vmatpush3.bf16.msra.mxu0 %v168_v7  ;;  %p230_p6 = pnand %p229_p5, %p223_p2 }
  0x31   :  { %162 = vmatmul.mubr.msk.f32.vlgmr.msra.gmra.mrb[0].mxu0 %vm53_vm1, %v41_v8 }
 0x104   :  { %v123_v10 = vpop.f32.mrb[0].mxu0 }
 0x105   :  { %v124_v11 = vadd.f32 %v146_v9, %v123_v10  ;;  %v163_v12 = vpop.f32.mrb[1].mxu0 }
 0x107   :  { %v127_v13 = vmax.f32 %v124_v11, 0.0 }
 0x109   :  { %129 = vst.msk [vmem:[#allocation7] sm:$0x3] %vm128_vm2, %v127_v13 }
 0x10a   :  { %233 = shalt.err (!%p230_p6)
}
 0x10b   :  { %s234_s2 = scalar_lea.hbm %s327_s3, 32 }
 0x10c   :  { %p235_p7 = scmp.ne.s32.totalorder %s327_s3, %s234_s2  ;;  %p238_p8 = scmp.lt.u32.totalorder %s234_s2, %s327_s3 }
 0x10e   :  { %p240_p9 = pnand %p238_p8, %p235_p7 }
 0x110   :  { %243 = shalt.err (!%p240_p9)
}
 0x111   :  { %139 = dma.vmem_to_hbm [thread:$0]  %s137_s12, 32, %s327_s3, [#allocation4]  }
 0x112   :  { %248 = dma.done.wait [#allocation4], 32  }
 0x113   :  { %249 = vsyncadd [#allocation4], 4294967264 }
 0x114   :  { %143 = vsyncpa [#allocation3], 1 }
 0x115   :  { %144 = vsyncpa [#allocation6], 1 }
 0x116   :  { %145 = vsyncpa [#allocation4], 1 }

</bundles_post_ra>
